<compile_context>
chip_gen: v7x
topology: tpu7x:2x2x1
jax: 0.10.0
libtpu: 0.0.40
codegen_flags: <defaults>
</compile_context>

<pallas_src>
import numpy as np
import jax
import jax.numpy as jnp
from jax.experimental import pallas as pl

# ---------------- module hyper-parameters (nn.Module __init__ args) ----------------
INPUT_SIZE = 128
OUT1, OUT2 = 8, 16
CONV1, POOL1 = 8, 2
CONV2, POOL2 = 3, 2
FC1, FC2 = 32, 16
NUM_BATCH_CLASSES = 3
BATCH = 4
BN_EPS = 1e-5


def _conv_len(L, K, s):
    return (L - K) // s + 1


# analytic replacement for _get_fc_input_size (same arithmetic as the PyTorch layers)
_L1 = _conv_len(INPUT_SIZE, CONV1, 2)     # 61
_L1P = _conv_len(_L1, POOL1, 2)           # 30  (odd trailing conv row dropped, floor-mode pool)
_L2 = _conv_len(_L1P, CONV2, 2)           # 14
_L2P = _conv_len(_L2, POOL2, 2)           # 7
FC_INPUT_SIZE = OUT2 * _L2P               # 112

# ---------------- padded / fused layout constants ----------------
S1W = OUT1 * _L1P                         # 240 real stage-1 columns per parity
S1PAD = 256                               # padded to a 128-multiple
S2W = FC_INPUT_SIZE                       # 112 real stage-2 columns per parity
S2PAD = 128
HPAD = 128                                # padded width of all head levels
OUTW = 8                                  # combined output slab width
TASK3_COL = 0                             # level-3 column layout
BAT3_LO = 4                               # batch logits at cols 4..6
DOM3_LO = 8                               # domain hidden at cols 8..23
DOM3_HI = DOM3_LO + FC2


# ---------------- the single fused Pallas kernel ----------------
def _mdab_fused_kernel(
    x_ref,                                   # (Npad, 128) f32
    m1_ref, s1_ref, b1_ref,                  # conv stage 1 fused GEMM + BN affine
    m2_ref, s2_ref, b2_ref,                  # conv stage 2 fused GEMM + BN affine
    w1_ref, b1h_ref,                         # fused first Linear of all 3 heads
    w2_ref, b2h_ref,                         # block-diag second Linears
    w3_ref, b3h_ref,                         # block-diag third Linears
    w4_ref, b4h_ref,                         # block-diag {id, dom-4th-Linear, id3}
    out_ref,                                 # (Npad, 8) f32  [task|dom|bat0..2|0 0 0]
):
    def mm(a, w_ref):
        # bf16 MXU matmul, f32 accumulation (each activation is consumed by
        # exactly one matmul, so the cast happens once per activation).
        return jnp.dot(a.astype(jnp.bfloat16), w_ref[...],
                       preferred_element_type=jnp.float32)

    def sigmoid(z):
        # overflow-safe sigmoid; reciprocal rides the otherwise-idle EUP slot
        e = jnp.exp(-jnp.abs(z))
        r = pl.reciprocal(1.0 + e, approx=True)
        return jnp.where(z >= 0.0, r, 1.0 - r)

    x = x_ref[...]

    # ---- stage 1: Conv1d(1->8,k=8,s=2) -> ReLU -> BN -> MaxPool1d(2,2)  (one matmul)
    y1 = mm(x, m1_ref)                                       # (N, 512)
    s1 = s1_ref[...]
    b1 = b1_ref[...]
    e1 = jnp.maximum(y1[:, 0:S1PAD], 0.0) * s1 + b1          # even conv row of each pool window
    o1 = jnp.maximum(y1[:, S1PAD:2 * S1PAD], 0.0) * s1 + b1  # odd conv row
    h1 = jnp.maximum(e1, o1)                                 # (N, 256); cols 240..255 are 0

    # ---- stage 2: Conv1d(8->16,k=3,s=2) -> ReLU -> BN -> MaxPool1d(2,2)  (one matmul)
    y2 = mm(h1, m2_ref)                                      # (N, 256)
    s2 = s2_ref[...]
    b2 = b2_ref[...]
    e2 = jnp.maximum(y2[:, 0:S2PAD], 0.0) * s2 + b2
    o2 = jnp.maximum(y2[:, S2PAD:2 * S2PAD], 0.0) * s2 + b2
    feats = jnp.maximum(e2, o2)                              # (N, 128); cols 0..111 == view(N,-1)

    # ---- head level 1: the three first Linears (+ReLU), one matmul
    h = jnp.maximum(mm(feats, w1_ref) + b1h_ref[...], 0.0)   # (N,128) [task|dom|bat|0]
    # ---- head level 2: block-diag {tw2, dw2, cw2} (+ReLU)
    g = jnp.maximum(mm(h, w2_ref) + b2h_ref[...], 0.0)       # (N,128) [t16|d32|c16|0]
    # ---- head level 3: block-diag {tw3, dw3, cw3}; ReLU only on the domain hidden cols
    z3 = mm(g, w3_ref) + b3h_ref[...]                        # (N,128)
    lane = jax.lax.broadcasted_iota(jnp.int32, z3.shape, 1)
    dom_cols = (lane >= DOM3_LO) & (lane < DOM3_HI)
    z3 = jnp.where(dom_cols, jnp.maximum(z3, 0.0), z3)
    # ---- head level 4: {task passthrough, dom 4th Linear, batch passthrough}
    z4 = mm(z3, w4_ref) + b4h_ref[...]                       # (N,8) [task|dom|b0 b1 b2|0 0 0]

    # ---- activations on the combined 8-lane slab
    sig = sigmoid(z4)                                        # valid for cols 0,1
    lane8 = jax.lax.broadcasted_iota(jnp.int32, z4.shape, 1)
    bat_mask = (lane8 >= 2) & (lane8 < 2 + NUM_BATCH_CLASSES)
    masked = jnp.where(bat_mask, z4, -jnp.inf)
    mx = jnp.max(masked, axis=-1, keepdims=True)
    ex = jnp.where(bat_mask, jnp.exp(z4 - mx), 0.0)
    sm = ex / jnp.sum(ex, axis=-1, keepdims=True)            # exact normalization
    out_ref[...] = jnp.where(lane8 < 2, sig, sm).astype(out_ref.dtype)


# ---------------- forward wrapper (one pallas_call, no grid) ----------------
def mdab_1d_forward(kp, x, alpha):
    """x: (N, 1, INPUT_SIZE) in PyTorch NCL layout.  alpha is unused in forward
    (ReverseLayerF only scales gradients in backward)."""
    del alpha
    N = x.shape[0]
    n_pad = ((N + 7) // 8) * 8                               # sublane-align the batch
    x2d = jnp.zeros((n_pad, INPUT_SIZE), jnp.float32)
    x2d = x2d.at[:N].set(x.reshape(N, INPUT_SIZE).astype(jnp.float32))

    # advisory cost hint (the kernel is tiny; keep XLA from over-serializing it)
    flops = 2 * n_pad * (INPUT_SIZE * 2 * S1PAD + S1PAD * 2 * S2PAD
                         + S2PAD * HPAD + 2 * HPAD * HPAD + HPAD * OUTW)
    weight_bytes = sum(int(np.prod(v.shape)) * v.dtype.itemsize for v in kp.values())
    cost = pl.CostEstimate(
        flops=flops,
        transcendentals=8 * n_pad,
        bytes_accessed=weight_bytes + x2d.size * 4 + n_pad * OUTW * 4,
    )

    out = pl.pallas_call(
        _mdab_fused_kernel,
        out_shape=jax.ShapeDtypeStruct((n_pad, OUTW), jnp.float32),
        cost_estimate=cost,
    )(
        x2d,
        kp["m1"], kp["s1"], kp["b1"],
        kp["m2"], kp["s2"], kp["b2"],
        kp["w1"], kp["b1h"],
        kp["w2"], kp["b2h"],
        kp["w3"], kp["b3h"],
        kp["w4"], kp["b4h"],
    )
    task = out[:N, 0]
    dom = out[:N, 1]
    bat = out[:N, 2:2 + NUM_BATCH_CLASSES]
    return task, dom, bat


# ---------------- one-time weight preparation (conv -> dense GEMM, fusion, padding) ----------------
def _conv_as_gemm(w, L_in, L_pool, col_major_channels):
    """Lower Conv1d(stride=2, bias=None) followed by MaxPool1d(2,2) into two dense
    GEMM matrices, one per parity of the pooling window (even / odd conv row).

    Input rows use the flattened (l, ci) layout `l*Cin + ci`; output columns are
    `lp*Cout + co` (position-major) or `co*L_pool + lp` (channel-major, used for
    the final stage so the flatten matches PyTorch's features.view(N, -1))."""
    Cout, Cin, K = w.shape
    lp = np.arange(L_pool)
    t = np.arange(K)
    ci = np.arange(Cin)
    co = np.arange(Cout)
    # conv position l = 2*lp + parity reads input rows 2*l + t = 4*lp + 2*parity + t
    rows_e = ((4 * lp[:, None, None, None] + t[None, :, None, None]) * Cin
              + ci[None, None, :, None])                                   # (Lp, K, Cin, 1)
    rows_o = rows_e + 2 * Cin
    if col_major_channels:
        cols = co[None, None, None, :] * L_pool + lp[:, None, None, None]  # (Lp, 1, 1, Cout)
    else:
        cols = lp[:, None, None, None] * Cout + co[None, None, None, :]
    vals = jnp.broadcast_to(jnp.transpose(w, (2, 1, 0))[None],             # vals[lp,t,ci,co]=w[co,ci,t]
                            (L_pool, K, Cin, Cout))
    zeros = jnp.zeros((L_in * Cin, L_pool * Cout), jnp.float32)
    return zeros.at[rows_e, cols].set(vals), zeros.at[rows_o, cols].set(vals)


def prepare_kernel_params(p):
    """Preprocess PyTorch-layout parameters into the fused, 128-aligned kernel layout."""
    assert POOL1 == 2 and POOL2 == 2, "even/odd GEMM lowering assumes MaxPool1d(kernel=2, stride=2)"

    def bf(a):
        return a.astype(jnp.bfloat16)

    def rowpad(vec, width):
        out = jnp.zeros((1, width), jnp.float32)
        return out.at[0, :vec.shape[0]].set(vec.astype(jnp.float32))

    kp = {}

    # ---- stage 1: fuse even|odd GEMMs and pad each parity block 240 -> 256
    m1e, m1o = _conv_as_gemm(p["conv1_w"], INPUT_SIZE, _L1P, col_major_channels=False)  # (128,240)
    M1 = jnp.zeros((INPUT_SIZE, 2 * S1PAD), jnp.float32)
    M1 = M1.at[:, 0:S1W].set(m1e).at[:, S1PAD:S1PAD + S1W].set(m1o)
    kp["m1"] = bf(M1)                                                  # (128, 512)
    kp["s1"] = rowpad(jnp.tile(p["bn1_scale"], _L1P), S1PAD)           # col = lp*8 + c
    kp["b1"] = rowpad(jnp.tile(p["bn1_shift"], _L1P), S1PAD)

    # ---- stage 2: fuse even|odd GEMMs, pad reduction 240->256 and each parity 112->128
    m2e, m2o = _conv_as_gemm(p["conv2_w"], _L1P, _L2P, col_major_channels=True)         # (240,112)
    M2 = jnp.zeros((S1PAD, 2 * S2PAD), jnp.float32)
    M2 = M2.at[0:S1W, 0:S2W].set(m2e).at[0:S1W, S2PAD:S2PAD + S2W].set(m2o)
    kp["m2"] = bf(M2)                                                  # (256, 256)
    kp["s2"] = rowpad(jnp.repeat(p["bn2_scale"], _L2P), S2PAD)         # col = c*7 + lp
    kp["b2"] = rowpad(jnp.repeat(p["bn2_shift"], _L2P), S2PAD)

    # ---- head level 1: concat the three first Linears, pad 112x96 -> 128x128
    W1 = jnp.zeros((S2PAD, HPAD), jnp.float32)
    W1 = W1.at[0:FC_INPUT_SIZE, 0:3 * FC1].set(
        jnp.concatenate([p["task_w"][0], p["dom_w"][0], p["bat_w"][0]], axis=1))
    kp["w1"] = bf(W1)
    b1v = jnp.zeros((HPAD,), jnp.float32)
    b1v = b1v.at[0:3 * FC1].set(
        jnp.concatenate([p["task_b"][0], p["dom_b"][0], p["bat_b"][0]]))
    kp["b1h"] = b1v.reshape(1, -1)

    # ---- head level 2: block-diag {tw2 (32,16), dw2 (32,32), cw2 (32,16)} -> 128x128
    W2 = jnp.zeros((HPAD, HPAD), jnp.float32)
    W2 = W2.at[0:FC1, 0:FC2].set(p["task_w"][1])
    W2 = W2.at[FC1:2 * FC1, FC2:FC2 + FC1].set(p["dom_w"][1])
    W2 = W2.at[2 * FC1:3 * FC1, FC2 + FC1:FC2 + FC1 + FC2].set(p["bat_w"][1])
    kp["w2"] = bf(W2)
    b2v = jnp.zeros((HPAD,), jnp.float32)
    b2v = b2v.at[0:FC2].set(p["task_b"][1])
    b2v = b2v.at[FC2:FC2 + FC1].set(p["dom_b"][1])
    b2v = b2v.at[FC2 + FC1:FC2 + FC1 + FC2].set(p["bat_b"][1])
    kp["b2h"] = b2v.reshape(1, -1)

    # ---- head level 3: block-diag {tw3 (16,1), dw3 (32,16), cw3 (16,3)} -> 128x128
    W3 = jnp.zeros((HPAD, HPAD), jnp.float32)
    W3 = W3.at[0:FC2, TASK3_COL:TASK3_COL + 1].set(p["task_w"][2])
    W3 = W3.at[FC2:FC2 + FC1, DOM3_LO:DOM3_HI].set(p["dom_w"][2])
    W3 = W3.at[FC2 + FC1:FC2 + FC1 + FC2,
               BAT3_LO:BAT3_LO + NUM_BATCH_CLASSES].set(p["bat_w"][2])
    kp["w3"] = bf(W3)
    b3v = jnp.zeros((HPAD,), jnp.float32)
    b3v = b3v.at[TASK3_COL:TASK3_COL + 1].set(p["task_b"][2])
    b3v = b3v.at[DOM3_LO:DOM3_HI].set(p["dom_b"][2])
    b3v = b3v.at[BAT3_LO:BAT3_LO + NUM_BATCH_CLASSES].set(p["bat_b"][2])
    kp["b3h"] = b3v.reshape(1, -1)

    # ---- head level 4: {task passthrough, dw4 (16,1), batch passthrough} -> 128x8
    W4 = jnp.zeros((HPAD, OUTW), jnp.float32)
    W4 = W4.at[TASK3_COL, 0].set(1.0)
    W4 = W4.at[DOM3_LO:DOM3_HI, 1:2].set(p["dom_w"][3])
    W4 = W4.at[BAT3_LO:BAT3_LO + NUM_BATCH_CLASSES,
               2:2 + NUM_BATCH_CLASSES].set(jnp.eye(NUM_BATCH_CLASSES, dtype=jnp.float32))
    kp["w4"] = bf(W4)
    b4v = jnp.zeros((OUTW,), jnp.float32)
    b4v = b4v.at[1:2].set(p["dom_b"][3])
    kp["b4h"] = b4v.reshape(1, -1)
    return kp


# ---------------- deterministic parameter init (PyTorch layouts) ----------------
def init_params(key):
    def nrm(k, shape, scale=0.1):
        return scale * jax.random.normal(k, shape, dtype=jnp.float32)

    keys = jax.random.split(key, 32)
    ki = iter(keys)

    p = {}
    p["conv1_w"] = nrm(next(ki), (OUT1, 1, CONV1))       # Conv1d weight (Cout, Cin, K)
    p["conv2_w"] = nrm(next(ki), (OUT2, OUT1, CONV2))

    def bn(c):
        gamma = 1.0 + 0.1 * jax.random.normal(next(ki), (c,), jnp.float32)
        beta = 0.1 * jax.random.normal(next(ki), (c,), jnp.float32)
        mean = 0.1 * jax.random.normal(next(ki), (c,), jnp.float32)
        var = jnp.abs(jax.random.normal(next(ki), (c,), jnp.float32)) + 0.5
        scale = gamma / jnp.sqrt(var + BN_EPS)           # eval-mode BN folded to affine
        shift = beta - mean * scale
        return scale, shift

    p["bn1_scale"], p["bn1_shift"] = bn(OUT1)
    p["bn2_scale"], p["bn2_shift"] = bn(OUT2)

    def linear(din, dout):
        kw, kb = jax.random.split(next(ki))
        return nrm(kw, (din, dout)), nrm(kb, (dout,))

    def head(dims):
        ws, bs = zip(*[linear(a, b) for a, b in dims])
        return list(ws), list(bs)

    p["task_w"], p["task_b"] = head([(FC_INPUT_SIZE, FC1), (FC1, FC2), (FC2, 1)])
    p["dom_w"], p["dom_b"] = head([(FC_INPUT_SIZE, FC1), (FC1, FC1), (FC1, FC2), (FC2, 1)])
    p["bat_w"], p["bat_b"] = head([(FC_INPUT_SIZE, FC1), (FC1, FC2), (FC2, NUM_BATCH_CLASSES)])
    return p


# ---------------- pure-JAX f32 reference (validation only, no Pallas) ----------------
def _reference_forward(params, x):
    def conv_stage(h, w, scale, shift):
        N, _, L = h.shape
        Cout, _, K = w.shape
        Lout = _conv_len(L, K, 2)
        idx = jnp.arange(Lout)[:, None] * 2 + jnp.arange(K)[None, :]
        patches = h[:, :, idx]                                   # (N, Cin, Lout, K)
        y = jnp.einsum("nclk,dck->ndl", patches, w)              # Conv1d, stride 2, no bias
        y = jnp.maximum(y, 0.0)                                  # ReLU
        y = y * scale[None, :, None] + shift[None, :, None]      # BatchNorm1d (eval)
        Lp = _conv_len(Lout, 2, 2)                               # MaxPool1d(2,2), floor mode
        return jnp.max(y[:, :, : 2 * Lp].reshape(N, Cout, Lp, 2), axis=-1)

    h = conv_stage(x, params["conv1_w"], params["bn1_scale"], params["bn1_shift"])
    h = conv_stage(h, params["conv2_w"], params["bn2_scale"], params["bn2_shift"])
    feats = h.reshape(h.shape[0], -1)

    def mlp(f, ws, bs, act):
        z = f
        for i, (w, b) in enumerate(zip(ws, bs)):
            z = z @ w + b
            if i < len(ws) - 1:
                z = jnp.maximum(z, 0.0)
        return jax.nn.sigmoid(z) if act == "sigmoid" else jax.nn.softmax(z, axis=-1)

    task = mlp(feats, params["task_w"], params["task_b"], "sigmoid")
    dom = mlp(feats, params["dom_w"], params["dom_b"], "sigmoid")
    bat = mlp(feats, params["bat_w"], params["bat_b"], "softmax")
    return task[:, 0], dom[:, 0], bat


# ---------------- main ----------------
if __name__ == "__main__":
    key = jax.random.PRNGKey(0)
    kparam, kx = jax.random.split(key)
    params = init_params(kparam)
    kp = prepare_kernel_params(params)            # one-time weight preprocessing

    x = jax.random.normal(kx, (BATCH, 1, INPUT_SIZE), dtype=jnp.float32)  # NCL like PyTorch
    alpha = jnp.float32(0.5)

    fwd = jax.jit(mdab_1d_forward)
    task_out, domain_out, batch_out = fwd(kp, x, alpha)
    jax.block_until_ready((task_out, domain_out, batch_out))

    # shape / sanity checks
    assert task_out.shape == (BATCH,)
    assert domain_out.shape == (BATCH,)
    assert batch_out.shape == (BATCH, NUM_BATCH_CLASSES)
    assert bool(jnp.all(jnp.isfinite(task_out)))
    assert bool(jnp.all(jnp.isfinite(domain_out)))
    assert bool(jnp.all(jnp.isfinite(batch_out)))
    # exact softmax normalization now (no approx reciprocal in the softmax path)
    assert bool(jnp.all(jnp.abs(jnp.sum(batch_out, axis=-1) - 1.0) < 1e-4))

    # compare against the pure-JAX f32 reference (kernel uses bf16 matmul weights)
    t_ref, d_ref, b_ref = _reference_forward(params, x)
    assert float(jnp.max(jnp.abs(task_out - t_ref))) < 2e-2
    assert float(jnp.max(jnp.abs(domain_out - d_ref))) < 2e-2
    assert float(jnp.max(jnp.abs(batch_out - b_ref))) < 2e-2

    print("KERNEL_OK")
</pallas_src>

<mosaic_0001>
module attributes {stable_mosaic.version = 11 : i64} {
  func.func @_mdab_fused_kernel(%arg0: memref<8x128xf32, #tpu.memory_space<vmem>>, %arg1: memref<128x512xbf16, #tpu.memory_space<vmem>>, %arg2: memref<1x256xf32, #tpu.memory_space<vmem>>, %arg3: memref<1x256xf32, #tpu.memory_space<vmem>>, %arg4: memref<256x256xbf16, #tpu.memory_space<vmem>>, %arg5: memref<1x128xf32, #tpu.memory_space<vmem>>, %arg6: memref<1x128xf32, #tpu.memory_space<vmem>>, %arg7: memref<128x128xbf16, #tpu.memory_space<vmem>>, %arg8: memref<1x128xf32, #tpu.memory_space<vmem>>, %arg9: memref<128x128xbf16, #tpu.memory_space<vmem>>, %arg10: memref<1x128xf32, #tpu.memory_space<vmem>>, %arg11: memref<128x128xbf16, #tpu.memory_space<vmem>>, %arg12: memref<1x128xf32, #tpu.memory_space<vmem>>, %arg13: memref<128x8xbf16, #tpu.memory_space<vmem>>, %arg14: memref<1x8xf32, #tpu.memory_space<vmem>>, %arg15: memref<8x8xf32, #tpu.memory_space<vmem>>) attributes {dimension_semantics = [], scalar_prefetch = 0 : i64, scratch_operands = 0 : i64, tpu.core_type = #tpu.core_type<tc>} {
    %c0 = arith.constant 0 : index
    %c0_0 = arith.constant 0 : index
    %0 = vector.load %arg0[%c0, %c0_0] : memref<8x128xf32, #tpu.memory_space<vmem>>, vector<8x128xf32>
    %1 = arith.truncf %0 : vector<8x128xf32> to vector<8x128xbf16>
    %c0_1 = arith.constant 0 : index
    %c0_2 = arith.constant 0 : index
    %2 = vector.load %arg1[%c0_1, %c0_2] : memref<128x512xbf16, #tpu.memory_space<vmem>>, vector<128x512xbf16>
    %cst = arith.constant dense<0.000000e+00> : vector<8x512xf32>
    %3 = tpu.matmul %1, %2, %cst {dimension_numbers = #tpu.dot_dimension_numbers<[1], [0], [0], [1], [0, 0, 1, 1], [], []>} : vector<8x128xbf16>, vector<128x512xbf16>, vector<8x512xf32> -> vector<8x512xf32>
    %c0_3 = arith.constant 0 : index
    %c0_4 = arith.constant 0 : index
    %4 = vector.load %arg2[%c0_3, %c0_4] : memref<1x256xf32, #tpu.memory_space<vmem>>, vector<1x256xf32>
    %c0_5 = arith.constant 0 : index
    %c0_6 = arith.constant 0 : index
    %5 = vector.load %arg3[%c0_5, %c0_6] : memref<1x256xf32, #tpu.memory_space<vmem>>, vector<1x256xf32>
    %6 = vector.extract_strided_slice %3 {offsets = [0, 0], sizes = [8, 256], strides = [1, 1]} : vector<8x512xf32> to vector<8x256xf32>
    %cst_7 = arith.constant 0.000000e+00 : f32
    %7 = vector.broadcast %cst_7 : f32 to vector<8x256xf32>
    %8 = arith.maximumf %6, %7 : vector<8x256xf32>
    %9 = vector.broadcast %4 : vector<1x256xf32> to vector<8x256xf32>
    %10 = arith.mulf %8, %9 : vector<8x256xf32>
    %11 = vector.broadcast %5 : vector<1x256xf32> to vector<8x256xf32>
    %12 = arith.addf %10, %11 : vector<8x256xf32>
    %13 = vector.extract_strided_slice %3 {offsets = [0, 256], sizes = [8, 256], strides = [1, 1]} : vector<8x512xf32> to vector<8x256xf32>
    %cst_8 = arith.constant 0.000000e+00 : f32
    %14 = vector.broadcast %cst_8 : f32 to vector<8x256xf32>
    %15 = arith.maximumf %13, %14 : vector<8x256xf32>
    %16 = vector.broadcast %4 : vector<1x256xf32> to vector<8x256xf32>
    %17 = arith.mulf %15, %16 : vector<8x256xf32>
    %18 = vector.broadcast %5 : vector<1x256xf32> to vector<8x256xf32>
    %19 = arith.addf %17, %18 : vector<8x256xf32>
    %20 = arith.maximumf %12, %19 : vector<8x256xf32>
    %21 = arith.truncf %20 : vector<8x256xf32> to vector<8x256xbf16>
    %c0_9 = arith.constant 0 : index
    %c0_10 = arith.constant 0 : index
    %22 = vector.load %arg4[%c0_9, %c0_10] : memref<256x256xbf16, #tpu.memory_space<vmem>>, vector<256x256xbf16>
    %cst_11 = arith.constant dense<0.000000e+00> : vector<8x256xf32>
    %23 = tpu.matmul %21, %22, %cst_11 {dimension_numbers = #tpu.dot_dimension_numbers<[1], [0], [0], [1], [0, 0, 1, 1], [], []>} : vector<8x256xbf16>, vector<256x256xbf16>, vector<8x256xf32> -> vector<8x256xf32>
    %c0_12 = arith.constant 0 : index
    %c0_13 = arith.constant 0 : index
    %24 = vector.load %arg5[%c0_12, %c0_13] : memref<1x128xf32, #tpu.memory_space<vmem>>, vector<1x128xf32>
    %c0_14 = arith.constant 0 : index
    %c0_15 = arith.constant 0 : index
    %25 = vector.load %arg6[%c0_14, %c0_15] : memref<1x128xf32, #tpu.memory_space<vmem>>, vector<1x128xf32>
    %26 = vector.extract_strided_slice %23 {offsets = [0, 0], sizes = [8, 128], strides = [1, 1]} : vector<8x256xf32> to vector<8x128xf32>
    %cst_16 = arith.constant 0.000000e+00 : f32
    %27 = vector.broadcast %cst_16 : f32 to vector<8x128xf32>
    %28 = arith.maximumf %26, %27 : vector<8x128xf32>
    %29 = vector.broadcast %24 : vector<1x128xf32> to vector<8x128xf32>
    %30 = arith.mulf %28, %29 : vector<8x128xf32>
    %31 = vector.broadcast %25 : vector<1x128xf32> to vector<8x128xf32>
    %32 = arith.addf %30, %31 : vector<8x128xf32>
    %33 = vector.extract_strided_slice %23 {offsets = [0, 128], sizes = [8, 128], strides = [1, 1]} : vector<8x256xf32> to vector<8x128xf32>
    %cst_17 = arith.constant 0.000000e+00 : f32
    %34 = vector.broadcast %cst_17 : f32 to vector<8x128xf32>
    %35 = arith.maximumf %33, %34 : vector<8x128xf32>
    %36 = vector.broadcast %24 : vector<1x128xf32> to vector<8x128xf32>
    %37 = arith.mulf %35, %36 : vector<8x128xf32>
    %38 = vector.broadcast %25 : vector<1x128xf32> to vector<8x128xf32>
    %39 = arith.addf %37, %38 : vector<8x128xf32>
    %40 = arith.maximumf %32, %39 : vector<8x128xf32>
    %41 = arith.truncf %40 : vector<8x128xf32> to vector<8x128xbf16>
    %c0_18 = arith.constant 0 : index
    %c0_19 = arith.constant 0 : index
    %42 = vector.load %arg7[%c0_18, %c0_19] : memref<128x128xbf16, #tpu.memory_space<vmem>>, vector<128x128xbf16>
    %cst_20 = arith.constant dense<0.000000e+00> : vector<8x128xf32>
    %43 = tpu.matmul %41, %42, %cst_20 {dimension_numbers = #tpu.dot_dimension_numbers<[1], [0], [0], [1], [0, 0, 1, 1], [], []>} : vector<8x128xbf16>, vector<128x128xbf16>, vector<8x128xf32> -> vector<8x128xf32>
    %c0_21 = arith.constant 0 : index
    %c0_22 = arith.constant 0 : index
    %44 = vector.load %arg8[%c0_21, %c0_22] : memref<1x128xf32, #tpu.memory_space<vmem>>, vector<1x128xf32>
    %45 = vector.broadcast %44 : vector<1x128xf32> to vector<8x128xf32>
    %46 = arith.addf %43, %45 : vector<8x128xf32>
    %cst_23 = arith.constant 0.000000e+00 : f32
    %47 = vector.broadcast %cst_23 : f32 to vector<8x128xf32>
    %48 = arith.maximumf %46, %47 : vector<8x128xf32>
    %49 = arith.truncf %48 : vector<8x128xf32> to vector<8x128xbf16>
    %c0_24 = arith.constant 0 : index
    %c0_25 = arith.constant 0 : index
    %50 = vector.load %arg9[%c0_24, %c0_25] : memref<128x128xbf16, #tpu.memory_space<vmem>>, vector<128x128xbf16>
    %cst_26 = arith.constant dense<0.000000e+00> : vector<8x128xf32>
    %51 = tpu.matmul %49, %50, %cst_26 {dimension_numbers = #tpu.dot_dimension_numbers<[1], [0], [0], [1], [0, 0, 1, 1], [], []>} : vector<8x128xbf16>, vector<128x128xbf16>, vector<8x128xf32> -> vector<8x128xf32>
    %c0_27 = arith.constant 0 : index
    %c0_28 = arith.constant 0 : index
    %52 = vector.load %arg10[%c0_27, %c0_28] : memref<1x128xf32, #tpu.memory_space<vmem>>, vector<1x128xf32>
    %53 = vector.broadcast %52 : vector<1x128xf32> to vector<8x128xf32>
    %54 = arith.addf %51, %53 : vector<8x128xf32>
    %cst_29 = arith.constant 0.000000e+00 : f32
    %55 = vector.broadcast %cst_29 : f32 to vector<8x128xf32>
    %56 = arith.maximumf %54, %55 : vector<8x128xf32>
    %57 = arith.truncf %56 : vector<8x128xf32> to vector<8x128xbf16>
    %c0_30 = arith.constant 0 : index
    %c0_31 = arith.constant 0 : index
    %58 = vector.load %arg11[%c0_30, %c0_31] : memref<128x128xbf16, #tpu.memory_space<vmem>>, vector<128x128xbf16>
    %cst_32 = arith.constant dense<0.000000e+00> : vector<8x128xf32>
    %59 = tpu.matmul %57, %58, %cst_32 {dimension_numbers = #tpu.dot_dimension_numbers<[1], [0], [0], [1], [0, 0, 1, 1], [], []>} : vector<8x128xbf16>, vector<128x128xbf16>, vector<8x128xf32> -> vector<8x128xf32>
    %c0_33 = arith.constant 0 : index
    %c0_34 = arith.constant 0 : index
    %60 = vector.load %arg12[%c0_33, %c0_34] : memref<1x128xf32, #tpu.memory_space<vmem>>, vector<1x128xf32>
    %61 = vector.broadcast %60 : vector<1x128xf32> to vector<8x128xf32>
    %62 = arith.addf %59, %61 : vector<8x128xf32>
    %63 = tpu.iota {dimensions = array<i32: 1>} : vector<8x128xi32>
    %c8_i32 = arith.constant 8 : i32
    %64 = vector.broadcast %c8_i32 : i32 to vector<8x128xi32>
    %65 = arith.cmpi sge, %63, %64 : vector<8x128xi32>
    %c24_i32 = arith.constant 24 : i32
    %66 = vector.broadcast %c24_i32 : i32 to vector<8x128xi32>
    %67 = arith.cmpi slt, %63, %66 : vector<8x128xi32>
    %68 = arith.andi %65, %67 : vector<8x128xi1>
    %cst_35 = arith.constant 0.000000e+00 : f32
    %69 = vector.broadcast %cst_35 : f32 to vector<8x128xf32>
    %70 = arith.maximumf %62, %69 : vector<8x128xf32>
    %71 = arith.select %68, %70, %62 : vector<8x128xi1>, vector<8x128xf32>
    %72 = arith.truncf %71 : vector<8x128xf32> to vector<8x128xbf16>
    %c0_36 = arith.constant 0 : index
    %c0_37 = arith.constant 0 : index
    %73 = vector.load %arg13[%c0_36, %c0_37] : memref<128x8xbf16, #tpu.memory_space<vmem>>, vector<128x8xbf16>
    %cst_38 = arith.constant dense<0.000000e+00> : vector<8x8xf32>
    %74 = tpu.matmul %72, %73, %cst_38 {dimension_numbers = #tpu.dot_dimension_numbers<[1], [0], [0], [1], [0, 0, 1, 1], [], []>} : vector<8x128xbf16>, vector<128x8xbf16>, vector<8x8xf32> -> vector<8x8xf32>
    %c0_39 = arith.constant 0 : index
    %c0_40 = arith.constant 0 : index
    %75 = vector.load %arg14[%c0_39, %c0_40] : memref<1x8xf32, #tpu.memory_space<vmem>>, vector<1x8xf32>
    %76 = vector.broadcast %75 : vector<1x8xf32> to vector<8x8xf32>
    %77 = arith.addf %74, %76 : vector<8x8xf32>
    %78 = math.absf %77 : vector<8x8xf32>
    %cst_41 = arith.constant 0.000000e+00 : f32
    %79 = vector.broadcast %cst_41 : f32 to vector<8x8xf32>
    %80 = arith.subf %79, %78 : vector<8x8xf32>
    %81 = math.exp %80 : vector<8x8xf32>
    %cst_42 = arith.constant 1.000000e+00 : f32
    %82 = vector.broadcast %cst_42 : f32 to vector<8x8xf32>
    %83 = arith.addf %82, %81 : vector<8x8xf32>
    %84 = tpu.reciprocal %83 {approx = true} : vector<8x8xf32> -> vector<8x8xf32>
    %cst_43 = arith.constant 0.000000e+00 : f32
    %85 = vector.broadcast %cst_43 : f32 to vector<8x8xf32>
    %86 = arith.cmpf oge, %77, %85 : vector<8x8xf32>
    %cst_44 = arith.constant 1.000000e+00 : f32
    %87 = vector.broadcast %cst_44 : f32 to vector<8x8xf32>
    %88 = arith.subf %87, %84 : vector<8x8xf32>
    %89 = arith.select %86, %84, %88 : vector<8x8xi1>, vector<8x8xf32>
    %90 = tpu.iota {dimensions = array<i32: 1>} : vector<8x8xi32>
    %c2_i32 = arith.constant 2 : i32
    %91 = vector.broadcast %c2_i32 : i32 to vector<8x8xi32>
    %92 = arith.cmpi sge, %90, %91 : vector<8x8xi32>
    %c5_i32 = arith.constant 5 : i32
    %93 = vector.broadcast %c5_i32 : i32 to vector<8x8xi32>
    %94 = arith.cmpi slt, %90, %93 : vector<8x8xi32>
    %95 = arith.andi %92, %94 : vector<8x8xi1>
    %cst_45 = arith.constant 0xFF800000 : f32
    %96 = vector.broadcast %cst_45 : f32 to vector<8x8xf32>
    %97 = arith.select %95, %77, %96 : vector<8x8xi1>, vector<8x8xf32>
    %cst_46 = arith.constant dense<0xFF800000> : vector<8xf32>
    %98 = vector.multi_reduction <maximumf>, %97, %cst_46 [1] : vector<8x8xf32> to vector<8xf32>
    %99 = vector.shape_cast %98 : vector<8xf32> to vector<8x1xf32>
    %100 = vector.broadcast %99 : vector<8x1xf32> to vector<8x8xf32>
    %101 = arith.subf %77, %100 : vector<8x8xf32>
    %102 = math.exp %101 : vector<8x8xf32>
    %cst_47 = arith.constant 0.000000e+00 : f32
    %103 = vector.broadcast %cst_47 : f32 to vector<8x8xf32>
    %104 = arith.select %95, %102, %103 : vector<8x8xi1>, vector<8x8xf32>
    %cst_48 = arith.constant dense<0.000000e+00> : vector<8xf32>
    %105 = vector.multi_reduction <add>, %104, %cst_48 [1] : vector<8x8xf32> to vector<8xf32>
    %106 = vector.shape_cast %105 : vector<8xf32> to vector<8x1xf32>
    %107 = vector.broadcast %106 : vector<8x1xf32> to vector<8x8xf32>
    %108 = arith.divf %104, %107 : vector<8x8xf32>
    %c2_i32_49 = arith.constant 2 : i32
    %109 = vector.broadcast %c2_i32_49 : i32 to vector<8x8xi32>
    %110 = arith.cmpi slt, %90, %109 : vector<8x8xi32>
    %111 = arith.select %110, %89, %108 : vector<8x8xi1>, vector<8x8xf32>
    %c0_50 = arith.constant 0 : index
    %c0_51 = arith.constant 0 : index
    %112 = vector.load %arg15[%c0_50, %c0_51] : memref<8x8xf32, #tpu.memory_space<vmem>>, vector<8x8xf32>
    tpu.vector_store %arg15[%c0_50, %c0_51], %111 {strides = array<i32>} : memref<8x8xf32, #tpu.memory_space<vmem>>, vector<8x8xf32>,
    return
  }
}

</mosaic_0001>

<bundles_post_ra>
// kernel: mdab_1d_forward.1
= control target key start
LH: loop header
LB: loop body
LE: loop exit
PB: predicated region body
PF: predicated region fallthrough
CT: control target
= control target key end

     0   :  { %20 = vsyncpa [#allocation3], 0  ;;  %s2196_s0 = inlined_call_operand.vmem [shape: f32[8,128], index: 0, kind: input, shape index: {}]   ;;  %s2197_s1 = inlined_call_operand.hbm [shape: bf16[128,512], index: 1, kind: input, shape index: {}]   ;;  %s2198_s2 = inlined_call_operand.hbm [shape: f32[1,256], index: 2, kind: input, shape index: {}]   ;;  %s2199_s3 = inlined_call_operand.hbm [shape: f32[1,256], index: 3, kind: input, shape index: {}]   ;;  %s2200_s4 = inlined_call_operand.hbm [shape: bf16[256,256], index: 4, kind: input, shape index: {}]   ;;  %s2201_s5 = inlined_call_operand.vmem [shape: f32[1,128], index: 5, kind: input, shape index: {}]   ;;  %s2202_s6 = inlined_call_operand.hbm [shape: f32[1,128], index: 6, kind: input, shape index: {}]   ;;  %s2203_s7 = inlined_call_operand.vmem [shape: bf16[128,128], index: 7, kind: input, shape index: {}]   ;;  %s2204_s8 = inlined_call_operand.hbm [shape: f32[1,128], index: 8, kind: input, shape index: {}]   ;;  %s2205_s9 = inlined_call_operand.hbm [shape: bf16[128,128], index: 9, kind: input, shape index: {}]   ;;  %s2206_s10 = inlined_call_operand.hbm [shape: f32[1,128], index: 10, kind: input, shape index: {}]   ;;  %s2207_s11 = inlined_call_operand.vmem [shape: bf16[128,128], index: 11, kind: input, shape index: {}]   ;;  %s2208_s12 = inlined_call_operand.hbm [shape: f32[1,128], index: 12, kind: input, shape index: {}]   ;;  %s2209_s13 = inlined_call_operand.vmem [shape: bf16[128,8], index: 13, kind: input, shape index: {}]   ;;  %s2210_s14 = inlined_call_operand.hbm [shape: f32[1,8], index: 14, kind: input, shape index: {}]   ;;  %s2211_s15 = inlined_call_operand.vmem [shape: f32[8,8], index: 15, kind: output, shape index: {}]  }
   0x1   :  { %21 = vsyncpa [#allocation5], 0 }
   0x2   :  { %22 = vsyncpa [#allocation8], 0 }
   0x3   :  { %23 = vsyncpa [#allocation11], 0 }
   0x4   :  { %24 = vsyncpa [#allocation14], 0 }
   0x5   :  { %25 = vsyncpa [#allocation17], 0  ;;  %s1844_s18 = smov [#allocation4]   ;;  %s1845_s20 = smov [#allocation7]  }
   0x6   :  { %s46_s19 = sshll.u32 %s1844_s18, 4  ;;  %s65_s21 = sshll.u32 %s1845_s20, 4  ;;  %s47_s19 = int_to_ptr.vmem [resolvable:$true] %s46_s19  ;;  %s1943_s21 = int_to_ptr.vmem [resolvable:$true] %s65_s21 }
   0x7   :  { %s1612_s24 = scalar_lea.hbm %s2198_s2, 32 }
   0x8   :  { %p1613_p0 = scmp.ne.s32.totalorder %s2198_s2, %s1612_s24  ;;  %p1616_p1 = scmp.lt.u32.totalorder %s1612_s24, %s2198_s2 }
   0xa   :  { %p1618_p2 = pnand %p1616_p1, %p1613_p0 }
   0xc   :  { %1621 = shalt.err (!%p1618_p2)
}
   0xd   :  { %s1622_s29 = scalar_lea.vmem %s47_s19, 32  ;;  %p1627_p4 = scmp.lt.s32.totalorder %s47_s19, %s47_s19 }
   0xe   :  { %p1623_p3 = scmp.ne.s32.totalorder %s47_s19, %s1622_s29  ;;  %p1628_p5 = scmp.lt.s32.totalorder %s1622_s29, %s1622_s29 }
  0x10   :  { %p1629_p6 = por %p1628_p5, %p1627_p4 }
  0x12   :  { %p1630_p7 = pnand %p1629_p6, %p1623_p3 }
  0x14   :  { %1633 = shalt.err (!%p1630_p7)
}
  0x15   :  { %49 = dma.hbm_to_vmem [thread:$0]  %s2198_s2, 32, %s47_s19, [#allocation5]  }
  0x16   :  { %s1634_s20 = scalar_lea.hbm %s2200_s4, 4096 }
  0x17   :  { %p1635_p8 = scmp.ne.s32.totalorder %s2200_s4, %s1634_s20  ;;  %p1638_p9 = scmp.lt.u32.totalorder %s1634_s20, %s2200_s4 }
  0x19   :  { %p1640_p10 = pnand %p1638_p9, %p1635_p8 }
  0x1b   :  { %1643 = shalt.err (!%p1640_p10)
}
  0x1c   :  { %s1644_s26 = scalar_lea.vmem %s1943_s21, 4096  ;;  %p1649_p12 = scmp.lt.s32.totalorder %s1943_s21, %s1943_s21 }
  0x1d   :  { %p1645_p11 = scmp.ne.s32.totalorder %s1943_s21, %s1644_s26  ;;  %p1650_p13 = scmp.lt.s32.totalorder %s1644_s26, %s1644_s26 }
  0x1f   :  { %p1651_p0 = por %p1650_p13, %p1649_p12 }
  0x21   :  { %p1652_p1 = pnand %p1651_p0, %p1645_p11 }
  0x23   :  { %1655 = shalt.err (!%p1652_p1)
}
  0x24   :  { %s1846_s2 = smov 128   ;;  %s1847_s19 = smov 8  }
  0x25   :  { %71 = dma.hbm_to_vmem [thread:$0]  %s2200_s4, 4096, %s1943_s21, [#allocation8], %s1846_s2, %s1846_s2, %s1847_s19  }
  0x26   :  { %s1848_s29 = smov [#allocation10]   ;;  %s1849_s16 = smov [#allocation13]  }
  0x27   :  { %s92_s30 = sshll.u32 %s1848_s29, 4  ;;  %s114_s17 = sshll.u32 %s1849_s16, 4  ;;  %s93_s30 = int_to_ptr.vmem [resolvable:$true] %s92_s30  ;;  %s115_s17 = int_to_ptr.vmem [resolvable:$true] %s114_s17 }
  0x28   :  { %s1656_s22 = scalar_lea.hbm %s2204_s8, 16 }
  0x29   :  { %p1657_p2 = scmp.ne.s32.totalorder %s2204_s8, %s1656_s22  ;;  %p1660_p3 = scmp.lt.u32.totalorder %s1656_s22, %s2204_s8 }
  0x2b   :  { %p1662_p4 = pnand %p1660_p3, %p1657_p2 }
  0x2d   :  { %1665 = shalt.err (!%p1662_p4)
}
  0x2e   :  { %s1666_s4 = scalar_lea.vmem %s93_s30, 16  ;;  %s1670_s21 = scalar_lea.vmem %s93_s30, 32 }
  0x2f   :  { %p1667_p5 = scmp.ne.s32.totalorder %s93_s30, %s1666_s4  ;;  %p1671_p6 = scmp.lt.s32.totalorder %s93_s30, %s93_s30 }
  0x30   :  { %p1672_p7 = scmp.lt.s32.totalorder %s1670_s21, %s1666_s4 }
  0x32   :  { %p1673_p8 = por %p1672_p7, %p1671_p6 }
  0x34   :  { %p1674_p9 = pnand %p1673_p8, %p1667_p5 }
  0x36   :  { %1677 = shalt.err (!%p1674_p9)
}
  0x37   :  { %95 = dma.hbm_to_vmem [thread:$0]  %s2204_s8, 16, %s93_s30, [#allocation11]  }
  0x38   :  { %s1678_s29 = scalar_lea.hbm %s2206_s10, 16 }
  0x39   :  { %p1679_p10 = scmp.ne.s32.totalorder %s2206_s10, %s1678_s29  ;;  %p1682_p11 = scmp.lt.u32.totalorder %s1678_s29, %s2206_s10 }
  0x3b   :  { %p1684_p12 = pnand %p1682_p11, %p1679_p10 }
  0x3d   :  { %1687 = shalt.err (!%p1684_p12)
}
  0x3e   :  { %s1688_s23 = scalar_lea.vmem %s115_s17, 16  ;;  %s1692_s24 = scalar_lea.vmem %s115_s17, 32 }
  0x3f   :  { %p1689_p13 = scmp.ne.s32.totalorder %s115_s17, %s1688_s23  ;;  %p1693_p0 = scmp.lt.s32.totalorder %s115_s17, %s115_s17 }
  0x40   :  { %p1694_p1 = scmp.lt.s32.totalorder %s1692_s24, %s1688_s23 }
  0x42   :  { %p1695_p2 = por %p1694_p1, %p1693_p0 }
  0x44   :  { %p1696_p3 = pnand %p1695_p2, %p1689_p13 }
  0x46   :  { %1699 = shalt.err (!%p1696_p3)
}
  0x47   :  { %117 = dma.hbm_to_vmem [thread:$0]  %s2206_s10, 16, %s115_s17, [#allocation14]  }
  0x48   :  { %s1850_s25 = smov [#allocation2]   ;;  %s1700_s2 = scalar_lea.hbm %s2197_s1, 4096 }
  0x49   :  { %s33_s26 = sshll.u32 %s1850_s25, 4  ;;  %p1701_p4 = scmp.ne.s32.totalorder %s2197_s1, %s1700_s2  ;;  %s34_s26 = int_to_ptr.vmem [resolvable:$true] %s33_s26 }
  0x4a   :  { %p1704_p5 = scmp.lt.u32.totalorder %s1700_s2, %s2197_s1 }
  0x4c   :  { %p1706_p6 = pnand %p1704_p5, %p1701_p4 }
  0x4e   :  { %1709 = shalt.err (!%p1706_p6)
}
  0x4f   :  { %s1710_s16 = scalar_lea.vmem %s34_s26, 4096  ;;  %p1715_p8 = scmp.lt.s32.totalorder %s34_s26, %s34_s26 }
  0x50   :  { %p1711_p7 = scmp.ne.s32.totalorder %s34_s26, %s1710_s16  ;;  %p1716_p9 = scmp.lt.s32.totalorder %s1710_s16, %s1710_s16 }
  0x52   :  { %p1717_p10 = por %p1716_p9, %p1715_p8 }
  0x54   :  { %p1718_p11 = pnand %p1717_p10, %p1711_p7 }
  0x56   :  { %1721 = shalt.err (!%p1718_p11)
}
  0x57   :  { %s1851_s10 = smov 256   ;;  %s1852_s17 = smov 16  }
  0x58   :  { %39 = dma.hbm_to_vmem [thread:$0]  %s2197_s1, 4096, %s34_s26, [#allocation3], %s1851_s10, %s1851_s10, %s1852_s17  }
  0x59   :  { %s1853_s22 = smov [#allocation6]   ;;  %s1854_s24 = smov [#allocation9]  }
  0x5a   :  { %s56_s23 = sshll.u32 %s1853_s22, 4  ;;  %s80_s8 = sshll.u32 %s1854_s24, 4  ;;  %s57_s23 = int_to_ptr.vmem [resolvable:$true] %s56_s23  ;;  %s81_s8 = int_to_ptr.vmem [resolvable:$true] %s80_s8 }
  0x5b   :  { %s1722_s4 = scalar_lea.hbm %s2199_s3, 32 }
  0x5c   :  { %p1723_p12 = scmp.ne.s32.totalorder %s2199_s3, %s1722_s4  ;;  %p1726_p13 = scmp.lt.u32.totalorder %s1722_s4, %s2199_s3 }
  0x5e   :  { %p1728_p0 = pnand %p1726_p13, %p1723_p12 }
  0x60   :  { %1731 = shalt.err (!%p1728_p0)
}
  0x61   :  { %s1732_s1 = scalar_lea.vmem %s57_s23, 32  ;;  %p1737_p2 = scmp.lt.s32.totalorder %s57_s23, %s57_s23 }
  0x62   :  { %p1733_p1 = scmp.ne.s32.totalorder %s57_s23, %s1732_s1  ;;  %p1738_p3 = scmp.lt.s32.totalorder %s1732_s1, %s1732_s1 }
  0x64   :  { %p1739_p4 = por %p1738_p3, %p1737_p2 }
  0x66   :  { %p1740_p5 = pnand %p1739_p4, %p1733_p1 }
  0x68   :  { %1743 = shalt.err (!%p1740_p5)
}
  0x69   :  { %59 = dma.hbm_to_vmem [thread:$0]  %s2199_s3, 32, %s57_s23, [#allocation5]  }
  0x6a   :  { %s1744_s10 = scalar_lea.hbm %s2202_s6, 16 }
  0x6b   :  { %p1745_p6 = scmp.ne.s32.totalorder %s2202_s6, %s1744_s10  ;;  %p1748_p7 = scmp.lt.u32.totalorder %s1744_s10, %s2202_s6 }
  0x6d   :  { %p1750_p8 = pnand %p1748_p7, %p1745_p6 }
  0x6f   :  { %1753 = shalt.err (!%p1750_p8)
}
  0x70   :  { %s1754_s24 = scalar_lea.vmem %s81_s8, 16  ;;  %s1758_s30 = scalar_lea.vmem %s81_s8, 32 }
  0x71   :  { %p1755_p9 = scmp.ne.s32.totalorder %s81_s8, %s1754_s24  ;;  %p1759_p10 = scmp.lt.s32.totalorder %s81_s8, %s81_s8 }
  0x72   :  { %p1760_p11 = scmp.lt.s32.totalorder %s1758_s30, %s1754_s24 }
  0x74   :  { %p1761_p12 = por %p1760_p11, %p1759_p10 }
  0x76   :  { %p1762_p13 = pnand %p1761_p12, %p1755_p9 }
  0x78   :  { %1765 = shalt.err (!%p1762_p13)
}
  0x79   :  { %83 = dma.hbm_to_vmem [thread:$0]  %s2202_s6, 16, %s81_s8, [#allocation8]  }
  0x7a   :  { %s1855_s25 = smov [#allocation12]   ;;  %s1766_s19 = scalar_lea.hbm %s2205_s9, 1024 }
  0x7b   :  { %s101_s4 = sshll.u32 %s1855_s25, 4  ;;  %p1767_p0 = scmp.ne.s32.totalorder %s2205_s9, %s1766_s19  ;;  %s102_s4 = int_to_ptr.vmem [resolvable:$true] %s101_s4 }
  0x7c   :  { %p1770_p1 = scmp.lt.u32.totalorder %s1766_s19, %s2205_s9 }
  0x7e   :  { %p1772_p2 = pnand %p1770_p1, %p1767_p0 }
  0x80   :  { %1775 = shalt.err (!%p1772_p2)
}
  0x81   :  { %s1776_s29 = scalar_lea.vmem %s102_s4, 1024  ;;  %p1781_p4 = scmp.lt.s32.totalorder %s102_s4, %s102_s4 }
  0x82   :  { %p1777_p3 = scmp.ne.s32.totalorder %s102_s4, %s1776_s29  ;;  %p1782_p5 = scmp.lt.s32.totalorder %s1776_s29, %s1776_s29 }
  0x84   :  { %p1783_p6 = por %p1782_p5, %p1781_p4 }
  0x86   :  { %p1784_p7 = pnand %p1783_p6, %p1777_p3 }
  0x88   :  { %1787 = shalt.err (!%p1784_p7)
}
  0x89   :  { %s1856_s6 = smov 64   ;;  %s1857_s8 = smov 4  }
  0x8a   :  { %107 = dma.hbm_to_vmem [thread:$0]  %s2205_s9, 1024, %s102_s4, [#allocation11], %s1856_s6, %s1856_s6, %s1857_s8  }
  0x8b   :  { %s1858_s17 = smov [#allocation15]   ;;  %s1859_s20 = smov [#allocation16]  }
  0x8c   :  { %s126_s18 = sshll.u32 %s1858_s17, 4  ;;  %s138_s22 = sshll.u32 %s1859_s20, 4  ;;  %s127_s18 = int_to_ptr.vmem [resolvable:$true] %s126_s18  ;;  %s139_s22 = int_to_ptr.vmem [resolvable:$true] %s138_s22 }
  0x8d   :  { %s1788_s3 = scalar_lea.hbm %s2208_s12, 16 }
  0x8e   :  { %p1789_p8 = scmp.ne.s32.totalorder %s2208_s12, %s1788_s3  ;;  %p1792_p9 = scmp.lt.u32.totalorder %s1788_s3, %s2208_s12 }
  0x90   :  { %p1794_p10 = pnand %p1792_p9, %p1789_p8 }
  0x92   :  { %1797 = shalt.err (!%p1794_p10)
}
  0x93   :  { %s1798_s9 = scalar_lea.vmem %s127_s18, 16  ;;  %s1802_s4 = scalar_lea.vmem %s127_s18, 32 }
  0x94   :  { %p1799_p11 = scmp.ne.s32.totalorder %s127_s18, %s1798_s9  ;;  %p1803_p12 = scmp.lt.s32.totalorder %s127_s18, %s127_s18 }
  0x95   :  { %p1804_p13 = scmp.lt.s32.totalorder %s1802_s4, %s1798_s9 }
  0x97   :  { %p1805_p0 = por %p1804_p13, %p1803_p12 }
  0x99   :  { %p1806_p1 = pnand %p1805_p0, %p1799_p11 }
  0x9b   :  { %1809 = shalt.err (!%p1806_p1)
}
  0x9c   :  { %129 = dma.hbm_to_vmem [thread:$0]  %s2208_s12, 16, %s127_s18, [#allocation14]  }
  0x9d   :  { %s1810_s28 = scalar_lea.hbm %s2210_s14, 16 }
  0x9e   :  { %p1811_p2 = scmp.ne.s32.totalorder %s2210_s14, %s1810_s28  ;;  %p1814_p3 = scmp.lt.u32.totalorder %s1810_s28, %s2210_s14 }
  0xa0   :  { %p1816_p4 = pnand %p1814_p3, %p1811_p2 }
  0xa2   :  { %1819 = shalt.err (!%p1816_p4)
}
  0xa3   :  { %s1820_s10 = scalar_lea.vmem %s139_s22, 16  ;;  %s1824_s17 = scalar_lea.vmem %s139_s22, 32 }
  0xa4   :  { %p1821_p5 = scmp.ne.s32.totalorder %s139_s22, %s1820_s10  ;;  %p1825_p6 = scmp.lt.s32.totalorder %s139_s22, %s139_s22 }
  0xa5   :  { %p1826_p7 = scmp.lt.s32.totalorder %s1824_s17, %s1820_s10 }
  0xa7   :  { %p1827_p8 = por %p1826_p7, %p1825_p6 }
  0xa9   :  { %p1828_p9 = pnand %p1827_p8, %p1821_p5 }
  0xab   :  { %1831 = shalt.err (!%p1828_p9)
}
  0xac   :  { %141 = dma.hbm_to_vmem [thread:$0]  %s2210_s14, 16, %s139_s22, [#allocation17]  }
  0xad   :  { %1832 = dma.done.wait [#allocation3], 4096  }
  0xae   :  { %1833 = vsyncadd [#allocation3], 4294963200 }
  0xaf   :  { %1834 = dma.done.wait [#allocation5], 64  }
  0xb0   :  { %1835 = vsyncadd [#allocation5], 4294967232 }
  0xb1   :  { %1836 = dma.done.wait [#allocation8], 4112  }
  0xb2   :  { %1837 = vsyncadd [#allocation8], 4294963184 }
  0xb3   :  { %1838 = dma.done.wait [#allocation11], 1040  }
  0xb4   :  { %1839 = vsyncadd [#allocation11], 4294966256 }
  0xb5   :  { %1840 = dma.done.wait [#allocation14], 32  }
  0xb6   :  { %1841 = vsyncadd [#allocation14], 4294967264 }
  0xb7   :  { %1842 = dma.done.wait [#allocation17], 16  }
  0xb8   :  { %1843 = vsyncadd [#allocation17], 4294967280  ;;  %v1860_v0 = vmov 0   ;;  %v1476_v1 = vld [vmem:[#allocation2 + $0x4] ss:$16 sps:$4 sm:$0xff]   ;;  %vm1862_vm0 = vmmov 0  }
  0xb9   :  { %399 = vmatprep.mubr.bf16.mxu0 %v1860_v0  ;;  %440 = vmatprep.mubr.bf16.mxu1 %v1860_v0  ;;  %v1478_v2 = vld [vmem:[#allocation2 + $0xc] ss:$16 sps:$4 sm:$0xff]   ;;  %v1480_v3 = vld [vmem:[#allocation2] ss:$16 sps:$4 sm:$0xff]   ;;  %v1481_v4 = vld [vmem:[#allocation2 + $0x8] ss:$16 sps:$4 sm:$0xff]  }
  0xba   :  { %367 = vmatprep.subr.bf16.mxu0 %v1476_v1  ;;  %408 = vmatprep.subr.bf16.mxu1 %v1478_v2  ;;  %v1482_v5 = vld [vmem:[#allocation2 + $0x24] ss:$16 sps:$4 sm:$0xff]   ;;  %v1484_v6 = vld [vmem:[#allocation2 + $0x2c] ss:$16 sps:$4 sm:$0xff]   ;;  %v1486_v7 = vld [vmem:[#allocation2 + $0x20] ss:$16 sps:$4 sm:$0xff]  }
  0xbb   :  { %368 = vmatpush1.bf16.msra.mxu0 %v1480_v3  ;;  %409 = vmatpush1.bf16.msra.mxu1 %v1481_v4  ;;  %v1487_v8 = vld [vmem:[#allocation2 + $0x28] ss:$16 sps:$4 sm:$0xff]   ;;  %v1488_v9 = vld [vmem:[#allocation2 + $0x44] ss:$16 sps:$4 sm:$0xff]   ;;  %v1490_v10 = vld [vmem:[#allocation2 + $0x4c] ss:$16 sps:$4 sm:$0xff]  }
  0xbc   :  { %369 = vmatprep.subr.bf16.mxu0 %v1482_v5  ;;  %410 = vmatprep.subr.bf16.mxu1 %v1484_v6  ;;  %v1492_v11 = vld [vmem:[#allocation2 + $0x40] ss:$16 sps:$4 sm:$0xff]   ;;  %v1493_v12 = vld [vmem:[#allocation2 + $0x48] ss:$16 sps:$4 sm:$0xff]   ;;  %v1494_v13 = vld [vmem:[#allocation2 + $0x64] ss:$16 sps:$4 sm:$0xff]  }
  0xbd   :  { %v1496_v14 = vld [vmem:[#allocation2 + $0x6c] ss:$16 sps:$4 sm:$0xff]   ;;  %v1498_v15 = vld [vmem:[#allocation2 + $0x60] ss:$16 sps:$4 sm:$0xff]   ;;  %v1499_v16 = vld [vmem:[#allocation2 + $0x68] ss:$16 sps:$4 sm:$0xff]  }
  0xbe   :  { %v1500_v17 = vld [vmem:[#allocation2 + $0x84] ss:$16 sps:$4 sm:$0xff]   ;;  %v1502_v18 = vld [vmem:[#allocation2 + $0x8c] ss:$16 sps:$4 sm:$0xff]   ;;  %v1504_v19 = vld [vmem:[#allocation2 + $0x80] ss:$16 sps:$4 sm:$0xff]  }
  0xbf   :  { %370 = vmatpush1.bf16.msra.mxu0 %v1486_v7  ;;  %411 = vmatpush1.bf16.msra.mxu1 %v1487_v8  ;;  %v1505_v20 = vld [vmem:[#allocation2 + $0x88] ss:$16 sps:$4 sm:$0xff]   ;;  %v1506_v21 = vld [vmem:[#allocation2 + $0xa4] ss:$16 sps:$4 sm:$0xff]   ;;  %v1508_v22 = vld [vmem:[#allocation2 + $0xac] ss:$16 sps:$4 sm:$0xff]  }
  0xc0   :  { %371 = vmatprep.subr.bf16.mxu0 %v1488_v9  ;;  %412 = vmatprep.subr.bf16.mxu1 %v1490_v10  ;;  %v1510_v23 = vld [vmem:[#allocation2 + $0xa0] ss:$16 sps:$4 sm:$0xff]   ;;  %v1511_v24 = vld [vmem:[#allocation2 + $0xa8] ss:$16 sps:$4 sm:$0xff]   ;;  %v1512_v25 = vld [vmem:[#allocation2 + $0xc4] ss:$16 sps:$4 sm:$0xff]   ;;  %v454_v9 = vlaneseq }
  0xc1   :  { %v1514_v26 = vld [vmem:[#allocation2 + $0xcc] ss:$16 sps:$4 sm:$0xff]   ;;  %v1516_v27 = vld [vmem:[#allocation2 + $0xc0] ss:$16 sps:$4 sm:$0xff]   ;;  %v1517_v28 = vld [vmem:[#allocation2 + $0xc8] ss:$16 sps:$4 sm:$0xff]  }
  0xc2   :  { %v1518_v29 = vld [vmem:[#allocation2 + $0xe4] ss:$16 sps:$4 sm:$0xff]   ;;  %v1520_v30 = vld [vmem:[#allocation2 + $0xec] ss:$16 sps:$4 sm:$0xff]   ;;  %v1522_v31 = vld [vmem:[#allocation2 + $0xe0] ss:$16 sps:$4 sm:$0xff]  }
  0xc3   :  { %372 = vmatpush1.bf16.msra.mxu0 %v1492_v11  ;;  %413 = vmatpush1.bf16.msra.mxu1 %v1493_v12  ;;  %v1523_v32 = vld [vmem:[#allocation2 + $0xe8] ss:$16 sps:$4 sm:$0xff]   ;;  %v173_v33 = vld [vmem:[%s2196_s0] sm:$0xff]  ;;  %v1527_v38 = vld [vmem:[#allocation7 + $0x10] ss:$8 sps:$4 sm:$0xff]   ;;  %v1861_v4 = vmov 0.0  }
  0xc4   :  { %373 = vmatprep.subr.bf16.mxu0 %v1494_v13  ;;  %414 = vmatprep.subr.bf16.mxu1 %v1496_v14  ;;  %v1526_v34 = vld [vmem:[#allocation7 + $0x4] ss:$8 sps:$4 sm:$0xff]   ;;  %v174_v35 = vpack.c.bf16 %v173_v33, %v173_v33  ;;  %v1524_v36 = vld [vmem:[#allocation7] ss:$8 sps:$4 sm:$0xff]   ;;  %v1529_v37 = vld [vmem:[#allocation7 + $0x14] ss:$8 sps:$4 sm:$0xff]  }
  0xc5   :  { %v1532_v39 = vld [vmem:[#allocation7 + $0x24] ss:$8 sps:$4 sm:$0xff]   ;;  %v1530_v40 = vld [vmem:[#allocation7 + $0x20] ss:$8 sps:$4 sm:$0xff]   ;;  %v1535_v41 = vld [vmem:[#allocation7 + $0x34] ss:$8 sps:$4 sm:$0xff]  }
  0xc6   :  { %v1533_v42 = vld [vmem:[#allocation7 + $0x30] ss:$8 sps:$4 sm:$0xff]   ;;  %v1538_v43 = vld [vmem:[#allocation7 + $0x44] ss:$8 sps:$4 sm:$0xff]   ;;  %v1536_v44 = vld [vmem:[#allocation7 + $0x40] ss:$8 sps:$4 sm:$0xff]  }
  0xc7   :  { %374 = vmatpush1.bf16.msra.mxu0 %v1498_v15  ;;  %415 = vmatpush1.bf16.msra.mxu1 %v1499_v16  ;;  %v1541_v45 = vld [vmem:[#allocation7 + $0x54] ss:$8 sps:$4 sm:$0xff]   ;;  %v1539_v46 = vld [vmem:[#allocation7 + $0x50] ss:$8 sps:$4 sm:$0xff]   ;;  %v1544_v47 = vld [vmem:[#allocation7 + $0x64] ss:$8 sps:$4 sm:$0xff]  }
  0xc8   :  { %375 = vmatprep.subr.bf16.mxu0 %v1500_v17  ;;  %416 = vmatprep.subr.bf16.mxu1 %v1502_v18  ;;  %v1542_v48 = vld [vmem:[#allocation7 + $0x60] ss:$8 sps:$4 sm:$0xff]   ;;  %v1547_v49 = vld [vmem:[#allocation7 + $0x74] ss:$8 sps:$4 sm:$0xff]   ;;  %v1545_v50 = vld [vmem:[#allocation7 + $0x70] ss:$8 sps:$4 sm:$0xff]  }
  0xc9   :  { %v1550_v51 = vld [vmem:[#allocation7 + $0x84] ss:$8 sps:$4 sm:$0xff]   ;;  %v1548_v52 = vld [vmem:[#allocation7 + $0x80] ss:$8 sps:$4 sm:$0xff]   ;;  %v1553_v53 = vld [vmem:[#allocation7 + $0x94] ss:$8 sps:$4 sm:$0xff]  }
  0xca   :  { %v1551_v54 = vld [vmem:[#allocation7 + $0x90] ss:$8 sps:$4 sm:$0xff]   ;;  %v1556_v55 = vld [vmem:[#allocation7 + $0xa4] ss:$8 sps:$4 sm:$0xff]   ;;  %v1554_v56 = vld [vmem:[#allocation7 + $0xa0] ss:$8 sps:$4 sm:$0xff]  }
  0xcb   :  { %376 = vmatpush1.bf16.msra.mxu0 %v1504_v19  ;;  %417 = vmatpush1.bf16.msra.mxu1 %v1505_v20  ;;  %v1559_v57 = vld [vmem:[#allocation7 + $0xb4] ss:$8 sps:$4 sm:$0xff]   ;;  %v1557_v58 = vld [vmem:[#allocation7 + $0xb0] ss:$8 sps:$4 sm:$0xff]   ;;  %v1562_v59 = vld [vmem:[#allocation7 + $0xc4] ss:$8 sps:$4 sm:$0xff]  }
  0xcc   :  { %377 = vmatprep.subr.bf16.mxu0 %v1506_v21  ;;  %418 = vmatprep.subr.bf16.mxu1 %v1508_v22  ;;  %v1560_v60 = vld [vmem:[#allocation7 + $0xc0] ss:$8 sps:$4 sm:$0xff]   ;;  %v1565_v61 = vld [vmem:[#allocation7 + $0xd4] ss:$8 sps:$4 sm:$0xff]   ;;  %v1563_v62 = vld [vmem:[#allocation7 + $0xd0] ss:$8 sps:$4 sm:$0xff]  }
  0xcd   :  { %v1568_v63 = vld [vmem:[#allocation7 + $0xe4] ss:$8 sps:$4 sm:$0xff]   ;;  %v1566_v0 = vld [vmem:[#allocation7 + $0xe0] ss:$8 sps:$4 sm:$0xff]   ;;  %v1571_v1 = vld [vmem:[#allocation7 + $0xf4] ss:$8 sps:$4 sm:$0xff]  }
  0xce   :  { %v1569_v2 = vld [vmem:[#allocation7 + $0xf0] ss:$8 sps:$4 sm:$0xff]   ;;  %v1572_v3 = vld [vmem:[%s2203_s7] sm:$0xff]   ;;  %v1573_v5 = vld [vmem:[%s2203_s7 + $0x8] sm:$0xff]   ;;  %v455_v10 = vshrl.u32 %v454_v9, 7  ;;  %vm1213_vm7 = vcmask 64512  }
  0xcf   :  { %378 = vmatpush1.bf16.msra.mxu0 %v1510_v23  ;;  %419 = vmatpush1.bf16.msra.mxu1 %v1511_v24  ;;  %v1574_v6 = vld [vmem:[%s2203_s7 + $0x10] sm:$0xff]   ;;  %v1575_v7 = vld [vmem:[%s2203_s7 + $0x18] sm:$0xff]   ;;  %v1576_v8 = vld [vmem:[%s2203_s7 + $0x20] sm:$0xff]  }
  0xd0   :  { %379 = vmatprep.subr.bf16.mxu0 %v1512_v25  ;;  %420 = vmatprep.subr.bf16.mxu1 %v1514_v26  ;;  %v456_v11 = vsub.s32 0, %v455_v10  ;;  %v449_v12 = vld [vmem:[#allocation4] sm:$0x3]  ;;  %v460_v13 = vsub.s32 1, %v455_v10  ;;  %v450_v14 = vld [vmem:[#allocation6] sm:$0x3] }
  0xd1   :  { %v1592_v10 = vld [vmem:[%s2207_s11 + $0x20] sm:$0xff]  }
  0xd2   :  { %v457_v15 = vrot.slane %v449_v12, %v456_v11  ;;  %v461_v18 = vrot.slane %v449_v12, %v460_v13  ;;  %v470_v20 = vrot.slane %v450_v14, %v456_v11  ;;  %v474_v25 = vrot.slane %v450_v14, %v460_v13  ;;  %v1593_v11 = vld [vmem:[%s2207_s11 + $0x28] sm:$0xff]   ;;  %v1305_v12 = vld [vmem:[#allocation10] ss:$0 sm:$0xff] }
  0xd3   :  { %380 = vmatpush1.bf16.msra.mxu0 %v1516_v27  ;;  %421 = vmatpush1.bf16.msra.mxu1 %v1517_v28 }
  0xd4   :  { %381 = vmatprep.subr.bf16.mxu0 %v1518_v29  ;;  %422 = vmatprep.subr.bf16.mxu1 %v1520_v30 }
  0xd7   :  { %382 = vmatpush1.bf16.msra.mxu0 %v1522_v31  ;;  %423 = vmatpush1.bf16.msra.mxu1 %v1523_v32 }
  0xd8   :  { %681 = vmatprep.subr.bf16.mxu0 %v1526_v34  ;;  %1377 = vmatprep.subr.bf16.mxu1 %v1861_v4 }
  0xda   :  { %400 = vmatmul.mubr.bf16.vlgmr.msra.gmra.mrb[0].mxu0 %v174_v35  ;;  %441 = vmatmul.mubr.bf16.vlgmr.msra.gmra.mrb[0].mxu1 %v174_v35 }
  0xdb   :  { %682 = vmatpush1.bf16.msra.mxu0 %v1524_v36  ;;  %1378 = vmatpush3.bf16.msra.mxu1 %v1572_v3  ;;  %v1587_v3 = vld [vmem:[#allocation12 + $0x38] sm:$0xff]  }
  0xdc   :  { %683 = vmatprep.subr.bf16.mxu0 %v1529_v37  ;;  %1379 = vmatprep.subr.bf16.mxu1 %v1861_v4 }
  0xdd   :  { %1393 = vmatprep.mubr.msk.bf16.mxu1 %vm1862_vm0, %v1861_v4 }
  0xdf   :  { %684 = vmatpush1.bf16.msra.mxu0 %v1527_v38  ;;  %1380 = vmatpush3.bf16.msra.mxu1 %v1573_v5  ;;  %v1588_v5 = vld [vmem:[%s2207_s11] sm:$0xff]  }
  0xe0   :  { %685 = vmatprep.subr.bf16.mxu0 %v1532_v39  ;;  %1381 = vmatprep.subr.bf16.mxu1 %v1861_v4 }
  0xe3   :  { %686 = vmatpush1.bf16.msra.mxu0 %v1530_v40  ;;  %1382 = vmatpush3.bf16.msra.mxu1 %v1574_v6  ;;  %v1589_v6 = vld [vmem:[%s2207_s11 + $0x8] sm:$0xff]  }
  0xe4   :  { %687 = vmatprep.subr.bf16.mxu0 %v1535_v41  ;;  %1383 = vmatprep.subr.bf16.mxu1 %v1861_v4 }
  0xe7   :  { %688 = vmatpush1.bf16.msra.mxu0 %v1533_v42  ;;  %1384 = vmatpush3.bf16.msra.mxu1 %v1575_v7  ;;  %v1590_v7 = vld [vmem:[%s2207_s11 + $0x10] sm:$0xff]  }
  0xe8   :  { %689 = vmatprep.subr.bf16.mxu0 %v1538_v43  ;;  %1385 = vmatprep.subr.bf16.mxu1 %v1861_v4  ;;  %v1577_v43 = vld [vmem:[%s2203_s7 + $0x28] sm:$0xff]  }
  0xeb   :  { %690 = vmatpush1.bf16.msra.mxu0 %v1536_v44  ;;  %1386 = vmatpush3.bf16.msra.mxu1 %v1576_v8  ;;  %v1578_v44 = vld [vmem:[%s2203_s7 + $0x30] sm:$0xff]   ;;  %v1591_v8 = vld [vmem:[%s2207_s11 + $0x18] sm:$0xff]  }
  0xec   :  { %691 = vmatprep.subr.bf16.mxu0 %v1541_v45  ;;  %1387 = vmatprep.subr.bf16.mxu1 %v1861_v4  ;;  %v1579_v45 = vld [vmem:[%s2203_s7 + $0x38] sm:$0xff]  }
  0xef   :  { %692 = vmatpush1.bf16.msra.mxu0 %v1539_v46  ;;  %1388 = vmatpush3.bf16.msra.mxu1 %v1577_v43 }
  0xf0   :  { %693 = vmatprep.subr.bf16.mxu0 %v1544_v47  ;;  %1389 = vmatprep.subr.bf16.mxu1 %v1861_v4  ;;  %v1303_v47 = vld [vmem:[%s2201_s5] ss:$0 sm:$0xff] }
  0xf3   :  { %694 = vmatpush1.bf16.msra.mxu0 %v1542_v48  ;;  %1390 = vmatpush3.bf16.msra.mxu1 %v1578_v44 }
  0xf4   :  { %695 = vmatprep.subr.bf16.mxu0 %v1547_v49  ;;  %1391 = vmatprep.subr.bf16.mxu1 %v1861_v4 }
  0xf7   :  { %696 = vmatpush1.bf16.msra.mxu0 %v1545_v50  ;;  %1392 = vmatpush3.bf16.msra.mxu1 %v1579_v45  ;;  %v1304_v50 = vld [vmem:[#allocation9] ss:$0 sm:$0xff] }
  0xf8   :  { %697 = vmatprep.subr.bf16.mxu0 %v1550_v51  ;;  %1397 = vmatprep.subr.bf16.mxu1 %v1861_v4 }
  0xfb   :  { %698 = vmatpush1.bf16.msra.mxu0 %v1548_v52 }
  0xfc   :  { %699 = vmatprep.subr.bf16.mxu0 %v1553_v53 }
  0xff   :  { %700 = vmatpush1.bf16.msra.mxu0 %v1551_v54 }
 0x100   :  { %701 = vmatprep.subr.bf16.mxu0 %v1556_v55 }
 0x103   :  { %702 = vmatpush1.bf16.msra.mxu0 %v1554_v56 }
 0x104   :  { %703 = vmatprep.subr.bf16.mxu0 %v1559_v57 }
 0x107   :  { %704 = vmatpush1.bf16.msra.mxu0 %v1557_v58 }
 0x108   :  { %705 = vmatprep.subr.bf16.mxu0 %v1562_v59  ;;  %v1580_v59 = vld [vmem:[#allocation12] sm:$0xff]  }
 0x10b   :  { %706 = vmatpush1.bf16.msra.mxu0 %v1560_v60 }
 0x10c   :  { %707 = vmatprep.subr.bf16.mxu0 %v1565_v61  ;;  %v1581_v61 = vld [vmem:[#allocation12 + $0x8] sm:$0xff]  }
 0x10f   :  { %708 = vmatpush1.bf16.msra.mxu0 %v1563_v62  ;;  %v1582_v62 = vld [vmem:[#allocation12 + $0x10] sm:$0xff]  }
 0x110   :  { %709 = vmatprep.subr.bf16.mxu0 %v1568_v63  ;;  %v1583_v63 = vld [vmem:[#allocation12 + $0x18] sm:$0xff]  }
 0x113   :  { %710 = vmatpush1.bf16.msra.mxu0 %v1566_v0  ;;  %v1584_v0 = vld [vmem:[#allocation12 + $0x20] sm:$0xff]  }
 0x114   :  { %711 = vmatprep.subr.bf16.mxu0 %v1571_v1  ;;  %v1585_v1 = vld [vmem:[#allocation12 + $0x28] sm:$0xff]  }
 0x117   :  { %712 = vmatpush1.bf16.msra.mxu0 %v1569_v2  ;;  %v1586_v2 = vld [vmem:[#allocation12 + $0x30] sm:$0xff]  }
 0x118   :  { %1417 = vmatprep.subr.bf16.mxu0 %v1861_v4 }
 0x1ad   :  { %v401_v16 = vpop.f32.mrb[0].mxu0  ;;  %v442_v17 = vpop.f32.mrb[0].mxu1 }
 0x1ae   :  { %v451_v19 = vmax.f32 %v401_v16, 0.0  ;;  %v479_v21 = vmax.f32 %v442_v17, 0.0  ;;  %v403_v22 = vpop.f32.mrb[1].mxu0  ;;  %v444_v23 = vpop.f32.mrb[1].mxu1 }
 0x1af   :  { %v452_v24 = vmax.f32 %v403_v22, 0.0  ;;  %v480_v26 = vmax.f32 %v444_v23, 0.0  ;;  %v405_v27 = vpop.f32.mrb[2].mxu0  ;;  %v446_v28 = vpop.f32.mrb[2].mxu1  ;;  %v1596_v22 = vld [vmem:[%s2209_s13] sm:$0xff]   ;;  %v1597_v23 = vld [vmem:[%s2209_s13 + $0x8] sm:$0xff]  }
 0x1b0   :  { %v464_v29 = vmul.f32 %v457_v15, %v451_v19  ;;  %v481_v30 = vmul.f32 %v479_v21, %v457_v15  ;;  %v406_v31 = vpop.f32.mrb[3].mxu0  ;;  %v447_v32 = vpop.f32.mrb[3].mxu1  ;;  %v1595_v21 = vld [vmem:[%s2207_s11 + $0x38] sm:$0xff]   ;;  %v1601_v27 = vld [vmem:[%s2209_s13 + $0x28] sm:$0xff]  }
 0x1b1   :  { %v465_v33 = vmul.f32 %v461_v18, %v452_v24  ;;  %v482_v34 = vmul.f32 %v480_v26, %v461_v18  ;;  %v1598_v24 = vld [vmem:[%s2209_s13 + $0x10] sm:$0xff]   ;;  %v1600_v26 = vld [vmem:[%s2209_s13 + $0x20] sm:$0xff]   ;;  %v1314_v28 = vld [vmem:[#allocation13] ss:$0 sm:$0xff] }
 0x1b2   :  { %v477_v35 = vadd.f32 %v470_v20, %v464_v29  ;;  %v483_v36 = vadd.f32 %v481_v30, %v470_v20  ;;  %v1594_v20 = vld [vmem:[%s2207_s11 + $0x30] sm:$0xff]  }
 0x1b3   :  { %v478_v37 = vadd.f32 %v474_v25, %v465_v33  ;;  %v484_v38 = vadd.f32 %v482_v34, %v474_v25  ;;  %v1599_v25 = vld [vmem:[%s2209_s13 + $0x18] sm:$0xff]  }
 0x1b4   :  { %v485_v39 = vmax.f32 %v477_v35, %v483_v36  ;;  %v1602_v36 = vld [vmem:[%s2209_s13 + $0x30] sm:$0xff]  }
 0x1b5   :  { %v486_v40 = vmax.f32 %v478_v37, %v484_v38  ;;  %v1603_v37 = vld [vmem:[%s2209_s13 + $0x38] sm:$0xff]   ;;  %v1082_v38 = vand.u32 127, %v454_v9 }
 0x1b6   :  { %v487_v42 = vpack.c.bf16 %v485_v39, %v485_v39  ;;  %v1323_v39 = vld [vmem:[#allocation15] ss:$0 sm:$0xff] }
 0x1b7   :  { %v488_v41 = vpack.c.bf16 %v486_v40, %v486_v40  ;;  %vm1083_vm1 = vcmp.ge.s32.totalorder %v1082_v38, 8  ;;  %vm1084_vm2 = vcmp.lt.s32.totalorder %v1082_v38, 24  ;;  %vm1209_vm4 = vcmp.ge.s32.totalorder %v1082_v38, 2 }
 0x1b8   :  { %vm1085_vm3 = vmand %vm1083_vm1, %vm1084_vm2  ;;  %vm1210_vm5 = vcmp.lt.s32.totalorder %v1082_v38, 5  ;;  %vm1226_vm8 = vcmp.lt.s32.totalorder %v1082_v38, 2 }
 0x1b9   :  { %713 = vmatprep.mubr.bf16.mxu0 %v488_v41  ;;  %vm1211_vm6 = vmand %vm1209_vm4, %vm1210_vm5 }
 0x1ba   :  { %714 = vmatmul.mubr.bf16.vlgmr.msra.gmra.mrb[4].mxu0 %v487_v42 }
 0x1bb   :  { %1433 = vmatprep.mubr.msk.bf16.mxu0 %vm1862_vm0, %v1861_v4  ;;  %1418 = vmatpush3.bf16.msra.mxu0 %v1588_v5 }
 0x1bc   :  { %1419 = vmatprep.subr.bf16.mxu0 %v1861_v4 }
 0x1bf   :  { %1420 = vmatpush3.bf16.msra.mxu0 %v1589_v6 }
 0x1c0   :  { %1421 = vmatprep.subr.bf16.mxu0 %v1861_v4 }
 0x1c3   :  { %1422 = vmatpush3.bf16.msra.mxu0 %v1590_v7 }
 0x1c4   :  { %1423 = vmatprep.subr.bf16.mxu0 %v1861_v4 }
 0x1c7   :  { %1424 = vmatpush3.bf16.msra.mxu0 %v1591_v8 }
 0x1c8   :  { %1425 = vmatprep.subr.bf16.mxu0 %v1861_v4 }
 0x1cb   :  { %1426 = vmatpush3.bf16.msra.mxu0 %v1592_v10 }
 0x1cc   :  { %1427 = vmatprep.subr.bf16.mxu0 %v1861_v4 }
 0x1cf   :  { %1428 = vmatpush3.bf16.msra.mxu0 %v1593_v11 }
 0x1d0   :  { %1429 = vmatprep.subr.bf16.mxu0 %v1861_v4 }
 0x1d3   :  { %1430 = vmatpush3.bf16.msra.mxu0 %v1594_v20 }
 0x1d4   :  { %1431 = vmatprep.subr.bf16.mxu0 %v1861_v4 }
 0x1d7   :  { %1432 = vmatpush3.bf16.msra.mxu0 %v1595_v21 }
 0x28d   :  { %v715_v46 = vpop.f32.mrb[4].mxu0 }
 0x28e   :  { %v724_v48 = vmax.f32 %v715_v46, 0.0  ;;  %v717_v49 = vpop.f32.mrb[5].mxu0 }
 0x28f   :  { %v739_v51 = vmax.f32 %v717_v49, 0.0  ;;  %v719_v52 = vpop.f32.mrb[6].mxu0 }
 0x290   :  { %v731_v53 = vmul.f32 %v1303_v47, %v724_v48  ;;  %v720_v54 = vpop.f32.mrb[7].mxu0 }
 0x291   :  { %v740_v55 = vmul.f32 %v1303_v47, %v739_v51 }
 0x292   :  { %v738_v56 = vadd.f32 %v1304_v50, %v731_v53 }
 0x293   :  { %v741_v57 = vadd.f32 %v1304_v50, %v740_v55 }
 0x295   :  { %v742_v58 = vmax.f32 %v738_v56, %v741_v57 }
 0x297   :  { %v743_v60 = vpack.c.bf16 %v742_v58, %v742_v58 }
 0x299   :  { %1394 = vmatmul.mubr.bf16.vlgmr.msra.gmra.mrb[4].mxu1 %v743_v60 }
 0x29a   :  { %1398 = vmatpush3.bf16.msra.mxu1 %v1580_v59  ;;  %1413 = vmatprep.mubr.msk.bf16.mxu1 %vm1862_vm0, %v1861_v4 }
 0x29b   :  { %1399 = vmatprep.subr.bf16.mxu1 %v1861_v4 }
 0x29e   :  { %1400 = vmatpush3.bf16.msra.mxu1 %v1581_v61 }
 0x29f   :  { %1401 = vmatprep.subr.bf16.mxu1 %v1861_v4 }
 0x2a2   :  { %1402 = vmatpush3.bf16.msra.mxu1 %v1582_v62 }
 0x2a3   :  { %1403 = vmatprep.subr.bf16.mxu1 %v1861_v4 }
 0x2a6   :  { %1404 = vmatpush3.bf16.msra.mxu1 %v1583_v63 }
 0x2a7   :  { %1405 = vmatprep.subr.bf16.mxu1 %v1861_v4 }
 0x2aa   :  { %1406 = vmatpush3.bf16.msra.mxu1 %v1584_v0 }
 0x2ab   :  { %1407 = vmatprep.subr.bf16.mxu1 %v1861_v4 }
 0x2ae   :  { %1408 = vmatpush3.bf16.msra.mxu1 %v1585_v1 }
 0x2af   :  { %1409 = vmatprep.subr.bf16.mxu1 %v1861_v4 }
 0x2b2   :  { %1410 = vmatpush3.bf16.msra.mxu1 %v1586_v2 }
 0x2b3   :  { %1411 = vmatprep.subr.bf16.mxu1 %v1861_v4 }
 0x2b6   :  { %1412 = vmatpush3.bf16.msra.mxu1 %v1587_v3 }
 0x2b7   :  { %1437 = vmatprep.subr.bf16.mxu1 %v1861_v4 }
 0x36c   :  { %v849_v13 = vpop.f32.mrb[4].mxu1 }
 0x36d   :  { %v850_v14 = vadd.f32 %v1305_v12, %v849_v13  ;;  %v1395_v15 = vpop.f32.mrb[5].mxu1 }
 0x36e   :  { %v852_v16 = vpop.f32.mrb[6].mxu1 }
 0x36f   :  { %v855_v17 = vmax.f32 %v850_v14, 0.0  ;;  %v1396_v18 = vpop.f32.mrb[7].mxu1 }
 0x371   :  { %v856_v19 = vpack.c.bf16 %v855_v17, %v855_v17 }
 0x373   :  { %1414 = vmatmul.mubr.bf16.vlgmr.msra.gmra.mrb[8].mxu1 %v856_v19 }
 0x374   :  { %1453 = vmatprep.mubr.msk.bf16.mxu1 %vm1862_vm0, %v1861_v4  ;;  %1438 = vmatpush3.bf16.msra.mxu1 %v1596_v22 }
 0x375   :  { %1439 = vmatprep.subr.bf16.mxu1 %v1861_v4 }
 0x378   :  { %1440 = vmatpush3.bf16.msra.mxu1 %v1597_v23 }
 0x379   :  { %1441 = vmatprep.subr.bf16.mxu1 %v1861_v4 }
 0x37c   :  { %1442 = vmatpush3.bf16.msra.mxu1 %v1598_v24 }
 0x37d   :  { %1443 = vmatprep.subr.bf16.mxu1 %v1861_v4 }
 0x380   :  { %1444 = vmatpush3.bf16.msra.mxu1 %v1599_v25 }
 0x381   :  { %1445 = vmatprep.subr.bf16.mxu1 %v1861_v4 }
 0x384   :  { %1446 = vmatpush3.bf16.msra.mxu1 %v1600_v26 }
 0x385   :  { %1447 = vmatprep.subr.bf16.mxu1 %v1861_v4 }
 0x388   :  { %1448 = vmatpush3.bf16.msra.mxu1 %v1601_v27 }
 0x389   :  { %1449 = vmatprep.subr.bf16.mxu1 %v1861_v4 }
 0x38c   :  { %1450 = vmatpush3.bf16.msra.mxu1 %v1602_v36 }
 0x38d   :  { %1451 = vmatprep.subr.bf16.mxu1 %v1861_v4  ;;  %v1332_v4 = vld [vmem:[#allocation16] ss:$0 sm:$0xff] }
 0x390   :  { %1452 = vmatpush3.bf16.msra.mxu1 %v1603_v37 }
 0x446   :  { %v962_v29 = vpop.f32.mrb[8].mxu1 }
 0x447   :  { %v963_v30 = vadd.f32 %v1314_v28, %v962_v29  ;;  %v1415_v31 = vpop.f32.mrb[9].mxu1 }
 0x448   :  { %v965_v32 = vpop.f32.mrb[10].mxu1 }
 0x449   :  { %v968_v33 = vmax.f32 %v963_v30, 0.0  ;;  %v1416_v34 = vpop.f32.mrb[11].mxu1 }
 0x44b   :  { %v969_v35 = vpack.c.bf16 %v968_v33, %v968_v33 }
 0x44d   :  { %1434 = vmatmul.mubr.bf16.vlgmr.msra.gmra.mrb[8].mxu0 %v969_v35 }
 0x520   :  { %v1075_v40 = vpop.f32.mrb[8].mxu0 }
 0x521   :  { %v1076_v41 = vadd.f32 %v1323_v39, %v1075_v40  ;;  %v1435_v42 = vpop.f32.mrb[9].mxu0 }
 0x522   :  { %v1078_v43 = vpop.f32.mrb[10].mxu0 }
 0x523   :  { %v1086_v44 = vmax.f32 %v1076_v41, 0.0  ;;  %v1436_v45 = vpop.f32.mrb[11].mxu0 }
 0x525   :  { %v1087_v46 = vsel %vm1085_vm3, %v1086_v44, %v1076_v41 }
 0x526   :  { %v1088_v47 = vpack.c.bf16 %v1087_v46, %v1087_v46 }
 0x528   :  { %1454 = vmatmul.mubr.bf16.vlgmr.msra.gmra.mrb[12].mxu1 %v1088_v47 }
 0x5fb   :  { %v1194_v48 = vpop.f32.mrb[12].mxu1 }
 0x5fc   :  { %v1195_v49 = vadd.f32 %v1332_v4, %v1194_v48  ;;  %v1455_v9 = vpop.f32.mrb[13].mxu1 }
 0x5fd   :  { %v1197_v50 = vpop.f32.mrb[14].mxu1 }
 0x5fe   :  { %v1456_v51 = vpop.f32.mrb[15].mxu1  ;;  %v1212_v52 = vsel %vm1211_vm6, %v1195_v49, -inf  ;;  %v1200_v60 = vand.u32 2147483647, %v1195_v49  ;;  %vm1206_vm9 = vcmp.ge.f32.partialorder %v1195_v49, 0.0 }
 0x5ff   :  { %v1214_v53 = vsel %vm1213_vm7, %v1212_v52, -inf }
 0x600   :  { %1215 = vmax.xlane.f32.xlu0 %v1214_v53  ;;  %v1201_v61 = vsub.f32 0.0, %v1200_v60 }
 0x602   :  { %v1202_v62 = vmul.f32 1.442695, %v1201_v61 }
 0x68d   :  { %v1216_v54 = vpop.xlane.xlu0 %1215 }
 0x68e   :  { %v1217_v55 = vsub.f32 %v1195_v49, %v1216_v54 }
 0x690   :  { %v1218_v56 = vmul.f32 1.442695, %v1217_v55 }
 0x692   :  { %1604 = vpow2.f32 %v1218_v56 }
 0x693   :  { %1606 = vpow2.f32 %v1202_v62 }
 0x69c   :  { %v1605_v57 = vpop.eup %1604 }
 0x69d   :  { %v1220_v58 = vsel %vm1211_vm6, %v1605_v57, 0.0  ;;  %v1607_v63 = vpop.eup %1606 }
 0x69e   :  { %v1221_v59 = vsel %vm1213_vm7, %v1220_v58, 0.0  ;;  %v1204_v0 = vadd.f32 1.0, %v1607_v63 }
 0x69f   :  { %1222 = vadd.xlane.f32.xlu0 %v1221_v59 }
 0x6a0   :  { %1608 = vrcp.f32 %v1204_v0 }
 0x6aa   :  { %v1609_v2 = vpop.eup %1608 }
 0x6ab   :  { %v1207_v3 = vsub.f32 1.0, %v1609_v2 }
 0x6ad   :  { %v1208_v7 = vsel %vm1206_vm9, %v1609_v2, %v1207_v3 }
 0x72c   :  { %v1223_v1 = vpop.xlane.xlu0 %1222 }
 0x72d   :  { %1610 = vrcp.f32 %v1223_v1 }
 0x737   :  { %v1611_v5 = vpop.eup %1610 }
 0x738   :  { %v1225_v6 = vmul.f32 %v1611_v5, %v1220_v58 }
 0x73a   :  { %v1227_v8 = vsel %vm1226_vm8, %v1208_v7, %v1225_v6 }
 0x73b   :  { %1228 = vst.msk [vmem:[%s2211_s15] sm:$0xff] %vm1213_vm7, %v1227_v8 }
 0x73c   :  { %1233 = vsyncpa [#allocation3], 1 }
 0x73d   :  { %1234 = vsyncpa [#allocation5], 1 }
 0x73e   :  { %1235 = vsyncpa [#allocation8], 1 }
 0x73f   :  { %1236 = vsyncpa [#allocation11], 1 }
 0x740   :  { %1237 = vsyncpa [#allocation14], 1 }
 0x741   :  { %1238 = vsyncpa [#allocation17], 1 }

</bundles_post_ra>
